<compile_context>
chip_gen: v7x
topology: tpu7x:2x2x1
jax: 0.10.0
libtpu: 0.0.40
codegen_flags: <defaults>
</compile_context>

<pallas_src>
import functools

import jax
import jax.numpy as jnp
from jax.experimental import pallas as pl
from jax.experimental.pallas import tpu as pltpu


def _triplet_kernel(a_ref, p_ref, n_ref, loss_ref, acc_ref, *,
                    margin, size_average, batch, tb):
    i = pl.program_id(0)

    @pl.when(i == 0)
    def _init():
        acc_ref[0] = jnp.float32(0.0)

    a = a_ref[...].astype(jnp.float32)
    p = p_ref[...].astype(jnp.float32)
    n = n_ref[...].astype(jnp.float32)

    # dist_pos - dist_neg = sum((a-p)^2 - (a-n)^2) = sum((p - n) * (p + n - 2a))
    # -> one VPU multiply and a single XLU cross-lane reduce per row.
    fused = (p - n) * (p + n - 2.0 * a)
    delta = jnp.sum(fused, axis=1, keepdims=True)                # (TB, 1)
    losses = jnp.maximum(delta + jnp.float32(margin), 0.0)       # (TB, 1)

    # Mask rows that belong to batch padding (tail block).
    row_ids = i * tb + jax.lax.broadcasted_iota(jnp.int32, (tb, 1), 0)
    losses = jnp.where(row_ids < batch, losses, 0.0)

    acc_ref[0] += jnp.sum(losses)

    @pl.when(i == pl.num_programs(0) - 1)
    def _finalize():
        total = acc_ref[0]
        if size_average:
            total = total / jnp.float32(batch)
        loss_ref[0, 0] = total


def _round_up(x, m):
    return ((x + m - 1) // m) * m


def triplet_loss(anchor, positive, negative, *, margin, size_average=True):
    """Pallas implementation of TripletLoss.forward.

    anchor/positive/negative: (B, D) arrays (any float dtype; math in f32).
    Returns a float32 scalar: mean (size_average=True) or sum of the per-row
    hinge losses relu(||a-p||^2 - ||a-n||^2 + margin).
    """
    assert anchor.shape == positive.shape == negative.shape
    assert anchor.ndim == 2
    B, D = anchor.shape
    itemsize = jnp.dtype(anchor.dtype).itemsize

    # Batch tile: biggest multiple of 8 such that 3 inputs x 2 pipeline
    # buffers x TB x D stays well inside the smallest scoped-VMEM default.
    budget_bytes = 12 * 1024 * 1024
    tb = budget_bytes // (6 * D * itemsize)
    tb = max(8, min(2048, (tb // 8) * 8))
    tb = min(tb, _round_up(B, 8))

    num_blocks = pl.cdiv(B, tb)
    b_pad = num_blocks * tb

    if b_pad != B:
        pad = ((0, b_pad - B), (0, 0))
        anchor = jnp.pad(anchor, pad)
        positive = jnp.pad(positive, pad)
        negative = jnp.pad(negative, pad)

    kernel = functools.partial(
        _triplet_kernel,
        margin=float(margin),
        size_average=bool(size_average),
        batch=B,
        tb=tb,
    )

    out = pl.pallas_call(
        kernel,
        out_shape=jax.ShapeDtypeStruct((1, 1), jnp.float32),
        grid=(num_blocks,),
        in_specs=[
            pl.BlockSpec((tb, D), lambda i: (i, 0)),
            pl.BlockSpec((tb, D), lambda i: (i, 0)),
            pl.BlockSpec((tb, D), lambda i: (i, 0)),
        ],
        out_specs=pl.BlockSpec((1, 1), lambda i: (0, 0), memory_space=pltpu.SMEM),
        scratch_shapes=[pltpu.SMEM((1,), jnp.float32)],
        compiler_params=pltpu.CompilerParams(
            dimension_semantics=("arbitrary",),   # scalar accumulator is carried
            vmem_limit_bytes=32 * 1024 * 1024,
        ),
    )(anchor, positive, negative)
    return out[0, 0]


def _triplet_loss_ref(anchor, positive, negative, margin, size_average=True):
    dp = jnp.sum((anchor - positive) ** 2, axis=1)
    dn = jnp.sum((anchor - negative) ** 2, axis=1)
    losses = jnp.maximum(dp - dn + margin, 0.0)
    return jnp.mean(losses) if size_average else jnp.sum(losses)


if __name__ == "__main__":
    key = jax.random.PRNGKey(0)
    k_a, k_p, k_n = jax.random.split(key, 3)

    # Small shapes consistent with the module: batch=6 (exercises the padding
    # + row-mask path since 6 is not a multiple of the 8-row sublane tile),
    # embedding dim=32.
    B, D = 6, 32
    margin = 1.0

    anchor = jax.random.normal(k_a, (B, D), dtype=jnp.float32)
    positive = jax.random.normal(k_p, (B, D), dtype=jnp.float32)
    negative = jax.random.normal(k_n, (B, D), dtype=jnp.float32)

    loss_mean = triplet_loss(anchor, positive, negative,
                             margin=margin, size_average=True)
    loss_mean = jax.block_until_ready(loss_mean)
    ref_mean = _triplet_loss_ref(anchor, positive, negative, margin, True)
    assert jnp.allclose(loss_mean, ref_mean, rtol=1e-5, atol=1e-5), (loss_mean, ref_mean)

    loss_sum = triplet_loss(anchor, positive, negative,
                            margin=margin, size_average=False)
    loss_sum = jax.block_until_ready(loss_sum)
    ref_sum = _triplet_loss_ref(anchor, positive, negative, margin, False)
    assert jnp.allclose(loss_sum, ref_sum, rtol=1e-5, atol=1e-5), (loss_sum, ref_sum)

    print("KERNEL_OK")
</pallas_src>

<mosaic_0001>
module attributes {stable_mosaic.version = 11 : i64} {
  func.func @_triplet_kernel(%arg0: i32, %arg1: memref<8x32xf32, #tpu.memory_space<vmem>>, %arg2: memref<8x32xf32, #tpu.memory_space<vmem>>, %arg3: memref<8x32xf32, #tpu.memory_space<vmem>>, %arg4: memref<1x1xf32, #tpu.memory_space<smem>>, %arg5: memref<1xf32, #tpu.memory_space<smem>>) attributes {dimension_semantics = [#tpu.dimension_semantics<arbitrary>], iteration_bounds = array<i64: 1>, scalar_prefetch = 0 : i64, scratch_operands = 1 : i64, tpu.core_type = #tpu.core_type<tc>, window_params = [{transform_indices = @transform_0, window_bounds = array<i64: 8, 32>}, {transform_indices = @transform_1, window_bounds = array<i64: 8, 32>}, {transform_indices = @transform_2, window_bounds = array<i64: 8, 32>}, {transform_indices = @transform_3, window_bounds = array<i64: 1, 1>}]} {
    %c0_i32 = arith.constant 0 : i32
    %0 = arith.cmpi eq, %arg0, %c0_i32 : i32
    %1 = arith.extui %0 : i1 to i32
    %c0_i32_0 = arith.constant 0 : i32
    %2 = arith.cmpi ne, %1, %c0_i32_0 : i32
    scf.if %2 {
      %cst_15 = arith.constant 0.000000e+00 : f32
      %c0_16 = arith.constant 0 : index
      %36 = memref.load %arg5[%c0_16] : memref<1xf32, #tpu.memory_space<smem>>
      memref.store %cst_15, %arg5[%c0_16] : memref<1xf32, #tpu.memory_space<smem>>
    } else {
    }
    %c0 = arith.constant 0 : index
    %c0_1 = arith.constant 0 : index
    %3 = vector.load %arg1[%c0, %c0_1] : memref<8x32xf32, #tpu.memory_space<vmem>>, vector<8x32xf32>
    %c0_2 = arith.constant 0 : index
    %c0_3 = arith.constant 0 : index
    %4 = vector.load %arg2[%c0_2, %c0_3] : memref<8x32xf32, #tpu.memory_space<vmem>>, vector<8x32xf32>
    %c0_4 = arith.constant 0 : index
    %c0_5 = arith.constant 0 : index
    %5 = vector.load %arg3[%c0_4, %c0_5] : memref<8x32xf32, #tpu.memory_space<vmem>>, vector<8x32xf32>
    %6 = arith.subf %4, %5 : vector<8x32xf32>
    %7 = arith.addf %4, %5 : vector<8x32xf32>
    %cst = arith.constant 2.000000e+00 : f32
    %8 = vector.broadcast %cst : f32 to vector<8x32xf32>
    %9 = arith.mulf %8, %3 : vector<8x32xf32>
    %10 = arith.subf %7, %9 : vector<8x32xf32>
    %11 = arith.mulf %6, %10 : vector<8x32xf32>
    %cst_6 = arith.constant dense<0.000000e+00> : vector<8xf32>
    %12 = vector.multi_reduction <add>, %11, %cst_6 [1] : vector<8x32xf32> to vector<8xf32>
    %13 = vector.shape_cast %12 : vector<8xf32> to vector<8x1xf32>
    %cst_7 = arith.constant 1.000000e+00 : f32
    %14 = vector.broadcast %cst_7 : f32 to vector<8x1xf32>
    %15 = arith.addf %13, %14 : vector<8x1xf32>
    %cst_8 = arith.constant 0.000000e+00 : f32
    %16 = vector.broadcast %cst_8 : f32 to vector<8x1xf32>
    %17 = arith.maximumf %15, %16 : vector<8x1xf32>
    %c8_i32 = arith.constant 8 : i32
    %18 = arith.muli %arg0, %c8_i32 : i32
    %19 = tpu.iota {dimensions = array<i32: 0>} : vector<8x1xi32>
    %20 = vector.broadcast %18 : i32 to vector<8x1xi32>
    %21 = arith.addi %20, %19 : vector<8x1xi32>
    %c6_i32 = arith.constant 6 : i32
    %22 = vector.broadcast %c6_i32 : i32 to vector<8x1xi32>
    %23 = arith.cmpi slt, %21, %22 : vector<8x1xi32>
    %cst_9 = arith.constant 0.000000e+00 : f32
    %24 = vector.broadcast %cst_9 : f32 to vector<8x1xf32>
    %25 = arith.select %23, %17, %24 : vector<8x1xi1>, vector<8x1xf32>
    %c0_10 = arith.constant 0 : index
    %26 = memref.load %arg5[%c0_10] : memref<1xf32, #tpu.memory_space<smem>>
    %27 = vector.shape_cast %25 : vector<8x1xf32> to vector<1x8x1xf32>
    %cst_11 = arith.constant dense<0.000000e+00> : vector<1xf32>
    %28 = vector.multi_reduction <add>, %27, %cst_11 [1, 2] : vector<1x8x1xf32> to vector<1xf32>
    %29 = vector.shape_cast %28 : vector<1xf32> to vector<1x1x1xf32>
    %30 = vector.extract %29[0, 0, 0] : f32 from vector<1x1x1xf32>
    %31 = arith.addf %26, %30 : f32
    %c0_12 = arith.constant 0 : index
    %32 = memref.load %arg5[%c0_12] : memref<1xf32, #tpu.memory_space<smem>>
    memref.store %31, %arg5[%c0_12] : memref<1xf32, #tpu.memory_space<smem>>
    %c0_i32_13 = arith.constant 0 : i32
    %33 = arith.cmpi eq, %arg0, %c0_i32_13 : i32
    %34 = arith.extui %33 : i1 to i32
    %c0_i32_14 = arith.constant 0 : i32
    %35 = arith.cmpi ne, %34, %c0_i32_14 : i32
    scf.if %35 {
      %c0_15 = arith.constant 0 : index
      %36 = memref.load %arg5[%c0_15] : memref<1xf32, #tpu.memory_space<smem>>
      %cst_16 = arith.constant 6.000000e+00 : f32
      %37 = arith.divf %36, %cst_16 : f32
      %c0_17 = arith.constant 0 : index
      %c0_18 = arith.constant 0 : index
      %38 = memref.load %arg4[%c0_17, %c0_18] : memref<1x1xf32, #tpu.memory_space<smem>>
      memref.store %37, %arg4[%c0_17, %c0_18] : memref<1x1xf32, #tpu.memory_space<smem>>
    } else {
    }
    return
  }
  func.func @transform_0(%arg0: i32) -> (i32, i32) {
    %c0_i32 = arith.constant 0 : i32
    %c0_i32_0 = arith.constant 0 : i32
    return %arg0, %c0_i32 : i32, i32
  }
  func.func @transform_1(%arg0: i32) -> (i32, i32) {
    %c0_i32 = arith.constant 0 : i32
    %c0_i32_0 = arith.constant 0 : i32
    return %arg0, %c0_i32 : i32, i32
  }
  func.func @transform_2(%arg0: i32) -> (i32, i32) {
    %c0_i32 = arith.constant 0 : i32
    %c0_i32_0 = arith.constant 0 : i32
    return %arg0, %c0_i32 : i32, i32
  }
  func.func @transform_3(%arg0: i32) -> (i32, i32) {
    %c0_i32 = arith.constant 0 : i32
    %c0_i32_0 = arith.constant 0 : i32
    %c0_i32_1 = arith.constant 0 : i32
    return %c0_i32, %c0_i32_0 : i32, i32
  }
}

</mosaic_0001>

<bundles_post_ra>
// kernel: tpu_custom_call.1
= control target key start
LH: loop header
LB: loop body
LE: loop exit
PB: predicated region body
PF: predicated region fallthrough
CT: control target
= control target key end

     0   :  { %8 = vsyncpa [#allocation4], 0  ;;  %s276_s0 = inlined_call_operand.hbm [shape: f32[8,32], index: 0, kind: input, shape index: {}]   ;;  %s277_s1 = inlined_call_operand.hbm [shape: f32[8,32], index: 1, kind: input, shape index: {}]   ;;  %s278_s2 = inlined_call_operand.hbm [shape: f32[8,32], index: 2, kind: input, shape index: {}]   ;;  %s279_s3 = inlined_call_operand.hbm [shape: f32[1,1], index: 3, kind: output, shape index: {}]  }
   0x1   :  { %9 = vsyncpa [#allocation7], 0 }
   0x2   :  { %10 = vsyncpa [#allocation5], 0  ;;  %s204_s12 = smov [#allocation6]   ;;  %s205_s14 = smov [#allocation3]  }
   0x3   :  { %s27_s13 = sshll.u32 %s204_s12, 4  ;;  %s17_s15 = sshll.u32 %s205_s14, 4  ;;  %s28_s13 = int_to_ptr.vmem [resolvable:$true] %s27_s13  ;;  %s18_s15 = int_to_ptr.vmem [resolvable:$true] %s17_s15 }
   0x4   :  { %s122_s18 = scalar_lea.hbm %s277_s1, 128 }
   0x5   :  { %p123_p0 = scmp.ne.s32.totalorder %s277_s1, %s122_s18  ;;  %p126_p1 = scmp.lt.u32.totalorder %s122_s18, %s277_s1 }
   0x7   :  { %p128_p2 = pnand %p126_p1, %p123_p0 }
   0x9   :  { %131 = shalt.err (!%p128_p2)
}
   0xa   :  { %s132_s23 = scalar_lea.vmem %s28_s13, 128  ;;  %p137_p4 = scmp.lt.s32.totalorder %s28_s13, %s28_s13 }
   0xb   :  { %p133_p3 = scmp.ne.s32.totalorder %s28_s13, %s132_s23  ;;  %p138_p5 = scmp.lt.s32.totalorder %s132_s23, %s132_s23 }
   0xd   :  { %p139_p6 = por %p138_p5, %p137_p4 }
   0xf   :  { %p140_p7 = pnand %p139_p6, %p133_p3 }
  0x11   :  { %143 = shalt.err (!%p140_p7)
}
  0x12   :  { %30 = dma.hbm_to_vmem [thread:$0]  %s277_s1, 128, %s28_s13, [#allocation7]  }
  0x13   :  { %s144_s28 = scalar_lea.hbm %s276_s0, 128 }
  0x14   :  { %p145_p8 = scmp.ne.s32.totalorder %s276_s0, %s144_s28  ;;  %p148_p9 = scmp.lt.u32.totalorder %s144_s28, %s276_s0 }
  0x16   :  { %p150_p10 = pnand %p148_p9, %p145_p8 }
  0x18   :  { %153 = shalt.err (!%p150_p10)
}
  0x19   :  { %s154_s6 = scalar_lea.vmem %s18_s15, 128  ;;  %p159_p12 = scmp.lt.s32.totalorder %s18_s15, %s18_s15 }
  0x1a   :  { %p155_p11 = scmp.ne.s32.totalorder %s18_s15, %s154_s6  ;;  %p160_p13 = scmp.lt.s32.totalorder %s154_s6, %s154_s6 }
  0x1c   :  { %p161_p0 = por %p160_p13, %p159_p12 }
  0x1e   :  { %p162_p1 = pnand %p161_p0, %p155_p11 }
  0x20   :  { %165 = shalt.err (!%p162_p1)
}
  0x21   :  { %20 = dma.hbm_to_vmem [thread:$0]  %s276_s0, 128, %s18_s15, [#allocation4]  }
  0x22   :  { %s206_s8 = smov [#allocation8]   ;;  %s166_s12 = scalar_lea.hbm %s278_s2, 128 }
  0x23   :  { %s37_s9 = sshll.u32 %s206_s8, 4  ;;  %p167_p2 = scmp.ne.s32.totalorder %s278_s2, %s166_s12  ;;  %s38_s9 = int_to_ptr.vmem [resolvable:$true] %s37_s9 }
  0x24   :  { %p170_p3 = scmp.lt.u32.totalorder %s166_s12, %s278_s2 }
  0x26   :  { %p172_p4 = pnand %p170_p3, %p167_p2 }
  0x28   :  { %175 = shalt.err (!%p172_p4)
}
  0x29   :  { %s176_s18 = scalar_lea.vmem %s38_s9, 128  ;;  %p181_p6 = scmp.lt.s32.totalorder %s38_s9, %s38_s9 }
  0x2a   :  { %p177_p5 = scmp.ne.s32.totalorder %s38_s9, %s176_s18  ;;  %p182_p7 = scmp.lt.s32.totalorder %s176_s18, %s176_s18 }
  0x2c   :  { %p183_p8 = por %p182_p7, %p181_p6 }
  0x2e   :  { %p184_p9 = pnand %p183_p8, %p177_p5 }
  0x30   :  { %187 = shalt.err (!%p184_p9)
}
  0x31   :  { %40 = dma.hbm_to_vmem [thread:$0]  %s278_s2, 128, %s38_s9, [#allocation7]  }
  0x32   :  { %198 = dma.done.wait [#allocation4], 128  }
  0x33   :  { %199 = vsyncadd [#allocation4], 4294967168 }
  0x34   :  { %200 = dma.done.wait [#allocation7], 256  }
  0x35   :  { %201 = vsyncadd [#allocation7], 4294967040  ;;  %v56_v0 = vld [vmem:[#allocation3] sm:$0xff]  ;;  %v57_v1 = vld [vmem:[#allocation6] sm:$0xff]  ;;  %vm64_vm0 = vcmask 261120   ;;  %v71_v9 = vlaneseq  ;;  %vm78_vm2 = vcmask 7168  }
  0x36   :  { %v58_v2 = vld [vmem:[#allocation8] sm:$0xff]  ;;  %v61_v5 = vmul.f32 2.0, %v56_v0  ;;  %s188_s22 = scalar_lea.hbm %s279_s3, 16 }
  0x37   :  { %v59_v3 = vsub.f32 %v57_v1, %v58_v2  ;;  %v60_v4 = vadd.f32 %v58_v2, %v57_v1  ;;  %v72_v10 = vshrl.u32 %v71_v9, 7  ;;  %p189_p10 = scmp.ne.s32.totalorder %s279_s3, %s188_s22  ;;  %p192_p11 = scmp.lt.u32.totalorder %s188_s22, %s279_s3 }
  0x39   :  { %v62_v6 = vsub.f32 %v60_v4, %v61_v5  ;;  %vm75_vm1 = vcmp.lt.s32.totalorder %v72_v10, 6  ;;  %p194_p12 = pnand %p192_p11, %p189_p10 }
  0x3b   :  { %v63_v7 = vmul.f32 %v62_v6, %v59_v3 }
  0x3d   :  { %v65_v8 = vsel %vm64_vm0, %v63_v7, 0.0 }
  0x3e   :  { %66 = vadd.xlane.f32.xlu0 %v65_v8 }
  0xcb   :  { %v67_v11 = vpop.xlane.xlu0 %66 }
  0xcc   :  { %v68_v12 = vadd.f32 1.0, %v67_v11 }
  0xce   :  { %v69_v13 = vmax.f32 %v68_v12, 0.0 }
  0xd0   :  { %v76_v14 = vsel %vm75_vm1, %v69_v13, 0.0 }
  0xd1   :  { %v79_v15 = vsel %vm78_vm2, %v76_v14, 0.0 }
  0xd2   :  { %80 = vadd.xlane.f32.xlu0 %v79_v15 }
 0x15f   :  { %v81_v16 = vpop.xlane.xlu0 %80 }
 0x160   :  { %v82_v17 = vrot.slane %v81_v16, 4 }
 0x162   :  { %v83_v18 = vadd.f32 %v82_v17, %v81_v16 }
 0x164   :  { %v84_v19 = vrot.slane %v83_v18, 2 }
 0x166   :  { %v85_v20 = vadd.f32 %v84_v19, %v83_v18 }
 0x168   :  { %v86_v21 = vrot.slane %v85_v20, 1 }
 0x16a   :  { %v87_v22 = vadd.f32 %v86_v21, %v85_v20 }
 0x16c   :  { %116 = vpush %v87_v22 }
 0x19d   :  { %s117_s2 = spop %116 }
 0x19e   :  { %s98_s19 = smul.f32 0.16666667, %s117_s2 }
 0x1a0   :  { %100 = sst [smem:[#allocation9]] %s98_s19 }
 0x1a1   :  { %197 = shalt.err (!%p194_p12)
}
 0x1a2   :  { %s207_s27 = smov [#allocation9]  }
 0x1a3   :  { %108 = dma.smem_to_hbm %s207_s27, 16, %s279_s3, [#allocation5]  }
 0x1a4   :  { %202 = dma.done.wait [#allocation5], 16  }
 0x1a5   :  { %203 = vsyncadd [#allocation5], 4294967280 }
 0x1a6   :  { %112 = sfence }
 0x1a7   :  { %113 = vsyncpa [#allocation4], 1 }
 0x1a8   :  { %114 = vsyncpa [#allocation7], 1 }
 0x1a9   :  { %115 = vsyncpa [#allocation5], 1 }

</bundles_post_ra>
